<compile_context>
chip_gen: v6e
topology: v6e:2x2x1
jax: 0.10.0
libtpu: 0.0.40
codegen_flags: <defaults>
</compile_context>

<pallas_src>
import functools

import jax
import jax.numpy as jnp
from jax import lax
from jax.experimental import pallas as pl
from jax.experimental.pallas import tpu as pltpu

LANES = 128
SUBLANES = 8


def _rmse_partial_kernel(a_ref, b_ref, o_ref, *, tile_rows, steps, total_rows, need_mask):
    """Accumulate sum((a-b)^2) for one row-range split into an (8, 128) partial block."""
    c = pl.program_id(0)   # split ("parallel") axis
    k = pl.program_id(1)   # reduction axis over row tiles

    @pl.when(k == 0)
    def _():
        o_ref[...] = jnp.zeros_like(o_ref)

    a = a_ref[...].astype(jnp.float32)
    b = b_ref[...].astype(jnp.float32)
    d = a - b
    if need_mask:
        # Mask rows past the true end of the slab (ragged last tile and/or clamped
        # overhang tiles of the split grid, whose reads are duplicated/garbage data).
        row_base = (c * steps + k) * tile_rows
        row_ids = lax.broadcasted_iota(jnp.int32, (tile_rows, LANES), 0) + row_base
        d = jnp.where(row_ids < total_rows, d, 0.0)
    sq = d * d
    # Reduce (tile_rows, 128) -> (8, 128) with plain elementwise vreg adds (VPU only);
    # the cross-lane/sublane reduction is deferred to the tiny epilogue in the wrapper.
    o_ref[...] += sq.reshape(tile_rows // SUBLANES, SUBLANES, LANES).sum(axis=0)


def rmse_loss(y_hat, y, eps=1e-06, tile_rows=4096, n_splits=2):
    """RMSE loss with reduction='mean': sqrt(mean((y_hat - y)^2) + eps)."""
    assert y_hat.shape == y.shape, "shapes must match"
    n = y_hat.size
    itemsize = jnp.dtype(y_hat.dtype).itemsize

    # Flatten in the native dtype (no f32 up-cast in the wrapper; the kernel up-casts
    # per tile on the VPU).
    flat_a = y_hat.reshape(-1)
    flat_b = y.reshape(-1)

    # Pad only when n is not a multiple of 8*128. Both inputs are padded identically
    # with zeros, so padded diffs contribute 0. (Only taken for "ragged" n.)
    block_elems = SUBLANES * LANES
    pad = (-n) % block_elems
    if pad:
        flat_a = jnp.pad(flat_a, (0, pad))
        flat_b = jnp.pad(flat_b, (0, pad))
    rows = (n + pad) // LANES          # multiple of 8
    a2d = flat_a.reshape(rows, LANES)
    b2d = flat_b.reshape(rows, LANES)

    # Tile sizing: as large as configured but never bigger than the slab; keep it a
    # multiple of 8 sublanes.
    tile_rows = max(SUBLANES, min(tile_rows, rows))
    tile_rows -= tile_rows % SUBLANES

    total_tiles = pl.cdiv(rows, tile_rows)
    nsplit = n_splits if total_tiles >= n_splits else 1
    steps = pl.cdiv(total_tiles, nsplit)

    # Mask is only needed if the last tile is ragged or the split grid overhangs.
    need_mask = (total_tiles * tile_rows != rows) or (nsplit * steps != total_tiles)

    def in_map(c, k):
        # Clamp so DMAs never start past the end of the slab; overhang tiles re-read
        # the last valid tile and are masked out inside the kernel.
        return (jnp.minimum(c * steps + k, total_tiles - 1), 0)

    kernel = functools.partial(
        _rmse_partial_kernel,
        tile_rows=tile_rows,
        steps=steps,
        total_rows=rows,
        need_mask=need_mask,
    )

    partials = pl.pallas_call(
        kernel,
        out_shape=jax.ShapeDtypeStruct((nsplit * SUBLANES, LANES), jnp.float32),
        grid_spec=pltpu.PrefetchScalarGridSpec(
            num_scalar_prefetch=0,
            grid=(nsplit, steps),
            in_specs=[
                pl.BlockSpec((tile_rows, LANES), in_map),
                pl.BlockSpec((tile_rows, LANES), in_map),
            ],
            # Same block index across the k axis -> resident (8,128) accumulator per split.
            out_specs=pl.BlockSpec((SUBLANES, LANES), lambda c, k: (c, 0)),
        ),
        compiler_params=pltpu.CompilerParams(
            dimension_semantics=("parallel", "arbitrary"),
        ),
        cost_estimate=pl.CostEstimate(
            flops=3 * n,
            transcendentals=0,
            bytes_accessed=2 * n * itemsize + nsplit * SUBLANES * LANES * 4,
        ),
    )(a2d, b2d)

    # Tiny epilogue: combine per-core (8,128) partials, then mean + sqrt.
    total = jnp.sum(partials)
    return jnp.sqrt(total / jnp.float32(n) + jnp.float32(eps))


if __name__ == "__main__":
    key = jax.random.PRNGKey(0)
    k1, k2, k3, k4, k5, k6 = jax.random.split(key, 6)

    # Primary example consistent with the module (NCHW-like regression target).
    y_hat = jax.random.normal(k1, (2, 4, 16, 16), dtype=jnp.float32)
    y = jax.random.normal(k2, (2, 4, 16, 16), dtype=jnp.float32)
    loss = rmse_loss(y_hat, y)
    jax.block_until_ready(loss)
    ref = jnp.sqrt(jnp.mean((y_hat - y) ** 2) + 1e-06)
    assert jnp.allclose(loss, ref, rtol=1e-5, atol=1e-6), (loss, ref)

    # Secondary check: low-precision input streamed in native dtype + ragged n (pad path).
    a_bf = jax.random.normal(k3, (3, 5, 7), dtype=jnp.bfloat16)
    b_bf = jax.random.normal(k4, (3, 5, 7), dtype=jnp.bfloat16)
    loss_bf = rmse_loss(a_bf, b_bf)
    jax.block_until_ready(loss_bf)
    d_bf = a_bf.astype(jnp.float32) - b_bf.astype(jnp.float32)
    ref_bf = jnp.sqrt(jnp.mean(d_bf * d_bf) + 1e-06)
    assert jnp.allclose(loss_bf, ref_bf, rtol=1e-4, atol=1e-6), (loss_bf, ref_bf)

    # Tertiary check: exercises the 2-way split grid and the in-kernel row mask.
    a_big = jax.random.normal(k5, (4000, 128), dtype=jnp.float32)
    b_big = jax.random.normal(k6, (4000, 128), dtype=jnp.float32)
    loss_big = rmse_loss(a_big, b_big, tile_rows=2048)
    jax.block_until_ready(loss_big)
    ref_big = jnp.sqrt(jnp.mean((a_big - b_big) ** 2) + 1e-06)
    assert jnp.allclose(loss_big, ref_big, rtol=1e-4, atol=1e-6), (loss_big, ref_big)

    print("KERNEL_OK")
</pallas_src>

<mosaic_0001>
module attributes {stable_mosaic.version = 11 : i64} {
  func.func @_rmse_partial_kernel(%arg0: i32, %arg1: i32, %arg2: memref<16x128xf32, #tpu.memory_space<vmem>>, %arg3: memref<16x128xf32, #tpu.memory_space<vmem>>, %arg4: memref<8x128xf32, #tpu.memory_space<vmem>>) attributes {dimension_semantics = [#tpu.dimension_semantics<parallel>, #tpu.dimension_semantics<arbitrary>], iteration_bounds = array<i64: 1, 1>, scalar_prefetch = 0 : i64, scratch_operands = 0 : i64, tpu.core_type = #tpu.core_type<tc>, window_params = [{transform_indices = @transform_0, window_bounds = array<i64: 16, 128>}, {transform_indices = @transform_1, window_bounds = array<i64: 16, 128>}, {transform_indices = @transform_2, window_bounds = array<i64: 8, 128>}]} {
    %c0_i32 = arith.constant 0 : i32
    %0 = arith.cmpi eq, %arg1, %c0_i32 : i32
    %1 = arith.extui %0 : i1 to i32
    %c0_i32_0 = arith.constant 0 : i32
    %2 = arith.cmpi ne, %1, %c0_i32_0 : i32
    scf.if %2 {
      %cst_8 = arith.constant 0.000000e+00 : f32
      %12 = vector.broadcast %cst_8 : f32 to vector<8x128xf32>
      %c0_9 = arith.constant 0 : index
      %c0_10 = arith.constant 0 : index
      %13 = vector.load %arg4[%c0_9, %c0_10] : memref<8x128xf32, #tpu.memory_space<vmem>>, vector<8x128xf32>
      tpu.vector_store %arg4[%c0_9, %c0_10], %12 {strides = array<i32>} : memref<8x128xf32, #tpu.memory_space<vmem>>, vector<8x128xf32>,
    } else {
    }
    %c0 = arith.constant 0 : index
    %c0_1 = arith.constant 0 : index
    %3 = vector.load %arg2[%c0, %c0_1] : memref<16x128xf32, #tpu.memory_space<vmem>>, vector<16x128xf32>
    %c0_2 = arith.constant 0 : index
    %c0_3 = arith.constant 0 : index
    %4 = vector.load %arg3[%c0_2, %c0_3] : memref<16x128xf32, #tpu.memory_space<vmem>>, vector<16x128xf32>
    %5 = arith.subf %3, %4 : vector<16x128xf32>
    %6 = arith.mulf %5, %5 : vector<16x128xf32>
    %c0_4 = arith.constant 0 : index
    %c0_5 = arith.constant 0 : index
    %7 = vector.load %arg4[%c0_4, %c0_5] : memref<8x128xf32, #tpu.memory_space<vmem>>, vector<8x128xf32>
    %8 = vector.shape_cast %6 : vector<16x128xf32> to vector<2x8x128xf32>
    %cst = arith.constant dense<0.000000e+00> : vector<8x128xf32>
    %9 = vector.multi_reduction <add>, %8, %cst [0] : vector<2x8x128xf32> to vector<8x128xf32>
    %10 = arith.addf %7, %9 : vector<8x128xf32>
    %c0_6 = arith.constant 0 : index
    %c0_7 = arith.constant 0 : index
    %11 = vector.load %arg4[%c0_6, %c0_7] : memref<8x128xf32, #tpu.memory_space<vmem>>, vector<8x128xf32>
    tpu.vector_store %arg4[%c0_6, %c0_7], %10 {strides = array<i32>} : memref<8x128xf32, #tpu.memory_space<vmem>>, vector<8x128xf32>,
    return
  }
  func.func @transform_0(%arg0: i32, %arg1: i32) -> (i32, i32) {
    %c1_i32 = arith.constant 1 : i32
    %0 = arith.muli %arg0, %c1_i32 : i32
    %1 = arith.addi %0, %arg1 : i32
    %c0_i32 = arith.constant 0 : i32
    %2 = arith.minsi %1, %c0_i32 : i32
    %c0_i32_0 = arith.constant 0 : i32
    %c0_i32_1 = arith.constant 0 : i32
    return %2, %c0_i32_0 : i32, i32
  }
  func.func @transform_1(%arg0: i32, %arg1: i32) -> (i32, i32) {
    %c1_i32 = arith.constant 1 : i32
    %0 = arith.muli %arg0, %c1_i32 : i32
    %1 = arith.addi %0, %arg1 : i32
    %c0_i32 = arith.constant 0 : i32
    %2 = arith.minsi %1, %c0_i32 : i32
    %c0_i32_0 = arith.constant 0 : i32
    %c0_i32_1 = arith.constant 0 : i32
    return %2, %c0_i32_0 : i32, i32
  }
  func.func @transform_2(%arg0: i32, %arg1: i32) -> (i32, i32) {
    %c0_i32 = arith.constant 0 : i32
    %c0_i32_0 = arith.constant 0 : i32
    return %arg0, %c0_i32 : i32, i32
  }
}

</mosaic_0001>

<bundles_post_ra>
// kernel: tpu_custom_call.1
= control target key start
LH: loop header
LB: loop body
LE: loop exit
PB: predicated region body
PF: predicated region fallthrough
CT: control target
= control target key end

     0   :  { %7 = vsyncpa [#allocation3], 0  ;;  %s198_s0 = inlined_call_operand.hbm [shape: f32[16,128], index: 0, kind: input, shape index: {}]   ;;  %s199_s1 = inlined_call_operand.hbm [shape: f32[16,128], index: 1, kind: input, shape index: {}]   ;;  %s200_s2 = inlined_call_operand.hbm [shape: f32[8,128], index: 2, kind: output, shape index: {}]  }
   0x1   :  { %8 = vsyncpa [#allocation6], 0 }
   0x2   :  { %9 = vsyncpa [#allocation4], 0  ;;  %s169_s9 = smov [#allocation2]  }
   0x3   :  { %s21_s10 = sshll.u32 %s169_s9, 4  ;;  %s22_s10 = int_to_ptr.vmem [resolvable:$true] %s21_s10 }
   0x4   :  { %s111_s11 = scalar_lea.vmem %s22_s10, 256  ;;  %p116_p1 = scmp.lt.s32.totalorder %s22_s10, %s22_s10 }
   0x5   :  { %p112_p0 = scmp.ne.s32.totalorder %s22_s10, %s111_s11  ;;  %p117_p2 = scmp.lt.s32.totalorder %s111_s11, %s111_s11 }
   0x7   :  { %p118_p3 = por %p117_p2, %p116_p1 }
   0x9   :  { %p119_p4 = pnand %p118_p3, %p112_p0 }
   0xb   :  { %122 = shalt.err (!%p119_p4)
}
   0xc   :  { %s170_s12 = smov 128   ;;  %s171_s13 = smov 8  }
   0xd   :  { %27 = dma.hbm_to_vmem [thread:$0]  %s198_s0, 256, %s22_s10, [#allocation3], %s170_s12, %s170_s12, %s171_s13  }
   0xe   :  { %s172_s16 = smov [#allocation5]  }
   0xf   :  { %s39_s17 = sshll.u32 %s172_s16, 4  ;;  %s40_s17 = int_to_ptr.vmem [resolvable:$true] %s39_s17 }
  0x10   :  { %s131_s18 = scalar_lea.vmem %s40_s17, 256  ;;  %p136_p6 = scmp.lt.s32.totalorder %s40_s17, %s40_s17 }
  0x11   :  { %p132_p5 = scmp.ne.s32.totalorder %s40_s17, %s131_s18  ;;  %p137_p7 = scmp.lt.s32.totalorder %s131_s18, %s131_s18 }
  0x13   :  { %p138_p8 = por %p137_p7, %p136_p6 }
  0x15   :  { %p139_p9 = pnand %p138_p8, %p132_p5 }
  0x17   :  { %142 = shalt.err (!%p139_p9)
}
  0x18   :  { %45 = dma.hbm_to_vmem [thread:$0]  %s199_s1, 256, %s40_s17, [#allocation6], %s170_s12, %s170_s12, %s171_s13  }
  0x19   :  { %163 = dma.done.wait [#allocation3], 256  }
  0x1a   :  { %164 = vsyncadd [#allocation3], 4294967040 }
  0x1b   :  { %165 = dma.done.wait [#allocation6], 256  }
  0x1c   :  { %166 = vsyncadd [#allocation6], 4294967040  ;;  %v65_v0 = vld [vmem:[#allocation2] sm:$0xff]  ;;  %v66_v1 = vld [vmem:[#allocation2 + $0x8] sm:$0xff]  ;;  %s173_s0 = smov [#allocation7]  }
  0x1d   :  { %v67_v2 = vld [vmem:[#allocation5] sm:$0xff]  ;;  %v68_v3 = vld [vmem:[#allocation5 + $0x8] sm:$0xff]  ;;  %s83_s21 = sshll.u32 %s173_s0, 4  ;;  %s84_s21 = int_to_ptr.vmem [resolvable:$true] %s83_s21 }
  0x1e   :  { %v69_v4 = vsub.f32 %v65_v0, %v67_v2  ;;  %v70_v5 = vsub.f32 %v66_v1, %v68_v3  ;;  %s143_s22 = scalar_lea.vmem %s84_s21, 128  ;;  %p148_p11 = scmp.lt.s32.totalorder %s84_s21, %s84_s21 }
  0x1f   :  { %p144_p10 = scmp.ne.s32.totalorder %s84_s21, %s143_s22  ;;  %p149_p12 = scmp.lt.s32.totalorder %s143_s22, %s143_s22 }
  0x20   :  { %v71_v6 = vmul.f32 %v69_v4, %v69_v4  ;;  %v72_v7 = vmul.f32 %v70_v5, %v70_v5 }
  0x21   :  { %p150_p13 = por %p149_p12, %p148_p11 }
  0x22   :  { %v74_v8 = vadd.f32 %v72_v7, %v71_v6 }
  0x23   :  { %p151_p0 = pnand %p150_p13, %p144_p10 }
  0x24   :  { %76 = vst [vmem:[#allocation7] sm:$0xff] %v74_v8 }
  0x25   :  { %154 = shalt.err (!%p151_p0)
}
  0x26   :  { %86 = dma.vmem_to_hbm [thread:$0]  %s84_s21, 128, %s200_s2, [#allocation4]  }
  0x27   :  { %167 = dma.done.wait [#allocation4], 128  }
  0x28   :  { %168 = vsyncadd [#allocation4], 4294967168 }
  0x29   :  { %90 = vsyncpa [#allocation3], 1 }
  0x2a   :  { %91 = vsyncpa [#allocation6], 1 }
  0x2b   :  { %92 = vsyncpa [#allocation4], 1 }

</bundles_post_ra>
